<compile_context>
chip_gen: v7x
topology: tpu7x:2x2x1
jax: 0.10.0
libtpu: 0.0.40
codegen_flags: <defaults>
</compile_context>

<pallas_src>
import functools

import jax
import jax.numpy as jnp
from jax.experimental import pallas as pl
from jax.experimental.pallas import tpu as pltpu


_LANE = 128
_SUB = 8
_NEG_BIG = -1e30
_CHUNK_TARGET = 16     # max timesteps folded into one grid step


def _round_up(n, m):
    return (n + m - 1) // m * m


def _pick_chunk(T, target=_CHUNK_TARGET):
    """Largest divisor of T that is <= target (so the grid tiles T exactly)."""
    for d in range(min(T, target), 0, -1):
        if T % d == 0:
            return d
    return 1


# --------------------------------------------------------------------------- #
# Kernel: one grid step == one chunk of Tc timesteps
# --------------------------------------------------------------------------- #
def _lstm_chunk_kernel(x_ref, h0_ref, c0_ref, w_ih_ref, w_hh_ref, b_cat_ref,
                       w_out_ref, b_out_ref, p_ref, h_ref, c_ref, gx_ref,
                       *, tc, bp, hp):
    @pl.when(pl.program_id(0) == 0)
    def _init():
        h_ref[...] = h0_ref[...]
        c_ref[...] = c0_ref[...]

    # Input projection for ALL tc timesteps of this chunk in one wide MXU pass
    # (M = tc*bp rows); the summed bias (b_ih + b_hh) is folded in here once.
    gx_ref[...] = (
        jnp.dot(x_ref[...].astype(jnp.bfloat16), w_ih_ref[...],
                preferred_element_type=jnp.float32)
        + b_cat_ref[...])

    h = h_ref[...]
    c = c_ref[...]

    # Inner time loop: fully unrolled at trace time (tc is small and static),
    # only the recurrent matmul h @ W_hh^T remains inside the recurrence.
    for t in range(tc):
        r0 = t * bp   # static, sublane-aligned (bp is a multiple of 8)
        gates = gx_ref[pl.ds(r0, bp), :] + jnp.dot(
            h.astype(jnp.bfloat16), w_hh_ref[...],
            preferred_element_type=jnp.float32)

        # Gate order matches PyTorch LSTMCell: i, f, g, o. Each slice is a
        # whole multiple-of-128-lane block (hp = padded hidden width).
        i_g = jax.nn.sigmoid(gates[:, 0 * hp:1 * hp])
        f_g = jax.nn.sigmoid(gates[:, 1 * hp:2 * hp])
        g_g = jnp.tanh(gates[:, 2 * hp:3 * hp])
        o_g = jax.nn.sigmoid(gates[:, 3 * hp:4 * hp])

        c = f_g * c + i_g * g_g
        h = o_g * jnp.tanh(c)

        # Output head on the *cell* state (matches the reference module), then
        # softmax over lanes; padded logit lanes carry -1e30 -> exp == 0.
        logits = (jnp.dot(c.astype(jnp.bfloat16), w_out_ref[...],
                          preferred_element_type=jnp.float32)
                  + b_out_ref[...])
        logits = logits - jnp.max(logits, axis=1, keepdims=True)
        e = jnp.exp(logits)
        p = e * pl.reciprocal(jnp.sum(e, axis=1, keepdims=True), approx=True)
        p_ref[pl.ds(r0, bp), :] = p.astype(p_ref.dtype)

    h_ref[...] = h
    c_ref[...] = c


# --------------------------------------------------------------------------- #
# pallas_call builder
# --------------------------------------------------------------------------- #
def _vmem_limit_bytes(Tc, Bp, Ip, Hp, Op):
    bf16, f32 = 2, 4
    resident = ((Ip * 4 * Hp + Hp * 4 * Hp + Hp * Op) * bf16   # bf16 weights
                + (4 * Hp + Op) * f32                           # biases
                + 4 * Bp * Hp * f32                             # h0, c0, h, c
                + Tc * Bp * 4 * Hp * f32)                       # gx scratch
    streamed = 2 * Tc * Bp * (Ip + Op) * f32                    # dbl-buffered x / p
    need = 2 * (resident + streamed) + (1 << 20)
    try:
        cap = int(pltpu.get_tpu_info().vmem_capacity_bytes)
    except Exception:
        cap = 64 << 20   # conservative (v7x per-core physical VMEM)
    # Leave ~15% headroom for compiler-internal scratch / pipeline buffers.
    return int(min(max(need, 32 << 20), int(cap * 0.85)))


def _lstm_seq_pallas_call(T, Tc, Bp, Ip, Hp, Op):
    n_chunks = T // Tc
    kernel = functools.partial(_lstm_chunk_kernel, tc=Tc, bp=Bp, hp=Hp)

    def const(shape):  # VMEM-resident across all grid steps
        return pl.BlockSpec(shape, lambda *_: (0,) * len(shape))

    grid_spec = pltpu.PrefetchScalarGridSpec(
        num_scalar_prefetch=0,
        grid=(n_chunks,),
        in_specs=[
            pl.BlockSpec((Tc * Bp, Ip), lambda c: (c, 0)),   # x chunk (streamed)
            const((Bp, Hp)),                                  # h0
            const((Bp, Hp)),                                  # c0
            const((Ip, 4 * Hp)),                              # W_ih^T (bf16)
            const((Hp, 4 * Hp)),                              # W_hh^T (bf16)
            const((1, 4 * Hp)),                               # b_ih + b_hh
            const((Hp, Op)),                                  # W_out^T (bf16)
            const((1, Op)),                                   # b_out (+ -1e30 pads)
        ],
        out_specs=(
            pl.BlockSpec((Tc * Bp, Op), lambda c: (c, 0)),   # p chunk (streamed)
            const((Bp, Hp)),                                  # final h (carry)
            const((Bp, Hp)),                                  # final c (carry)
        ),
        scratch_shapes=[pltpu.VMEM((Tc * Bp, 4 * Hp), jnp.float32)],
    )
    return pl.pallas_call(
        kernel,
        grid_spec=grid_spec,
        out_shape=(
            jax.ShapeDtypeStruct((T * Bp, Op), jnp.float32),
            jax.ShapeDtypeStruct((Bp, Hp), jnp.float32),
            jax.ShapeDtypeStruct((Bp, Hp), jnp.float32),
        ),
        compiler_params=pltpu.CompilerParams(
            dimension_semantics=("arbitrary",),   # time is a sequential recurrence
            vmem_limit_bytes=_vmem_limit_bytes(Tc, Bp, Ip, Hp, Op),
        ),
    )


def _run_sequence(x_flat, h0, c0, packed, T, Bp):
    Ip, Hp, Op = packed["Ip"], packed["Hp"], packed["Op"]
    Tc = _pick_chunk(T)
    call = _lstm_seq_pallas_call(T, Tc, Bp, Ip, Hp, Op)
    return call(x_flat, h0, c0,
                packed["w_ih"], packed["w_hh"], packed["b_cat"],
                packed["w_out"], packed["b_out"])


# --------------------------------------------------------------------------- #
# Wrappers matching the PyTorch module API
# --------------------------------------------------------------------------- #
def lstm_forward(x, h, c, params):
    """One step, mirrors LSTM.forward: returns (h', c', p)."""
    I, H, O = params["dims"]
    pk = params["packed"]
    Ip, Hp, Op = pk["Ip"], pk["Hp"], pk["Op"]
    B = x.shape[0]
    Bp = _round_up(B, _SUB)
    x_p = jnp.pad(x, ((0, Bp - B), (0, Ip - I)))      # (Bp, Ip) == one timestep
    h_p = jnp.pad(h, ((0, Bp - B), (0, Hp - H)))
    c_p = jnp.pad(c, ((0, Bp - B), (0, Hp - H)))
    p_seq, h_f, c_f = _run_sequence(x_p, h_p, c_p, pk, T=1, Bp=Bp)
    return h_f[:B, :H], c_f[:B, :H], p_seq[:B, :O]


def recurrent_forward(x_series, params):
    """Mirrors LSTM.recurrent_forward: x (B, input_dims, T) -> (T*B, output_dims)."""
    I, H, O = params["dims"]
    pk = params["packed"]
    Ip, Hp, Op = pk["Ip"], pk["Hp"], pk["Op"]
    B, _, T = x_series.shape
    Bp = _round_up(B, _SUB)
    x_tbi = jnp.transpose(x_series, (2, 0, 1))                     # (T, B, I)
    x_tbi = jnp.pad(x_tbi, ((0, 0), (0, Bp - B), (0, Ip - I)))     # (T, Bp, Ip)
    x_flat = x_tbi.reshape(T * Bp, Ip)                             # time-major rows
    h0 = jnp.broadcast_to(pk["h0"], (Bp, Hp))
    c0 = jnp.broadcast_to(pk["c0"], (Bp, Hp))
    p_flat, _, _ = _run_sequence(x_flat, h0, c0, pk, T=T, Bp=Bp)
    p = p_flat.reshape(T, Bp, Op)[:, :B, :O]
    return p.reshape(T * B, O)


# --------------------------------------------------------------------------- #
# Parameters (PyTorch shapes) + kernel-friendly packing
# --------------------------------------------------------------------------- #
def _pack_params(raw, I, H, O):
    Ip, Hp, Op = _round_up(I, _LANE), _round_up(H, _LANE), _round_up(O, _LANE)

    def pad_gate_cols(w_t):                 # (n, 4H) -> (n, 4*Hp), per-gate zero pad
        n = w_t.shape[0]
        return jnp.pad(w_t.reshape(n, 4, H),
                       ((0, 0), (0, 0), (0, Hp - H))).reshape(n, 4 * Hp)

    w_ih = jnp.pad(pad_gate_cols(raw["w_ih"].T),
                   ((0, Ip - I), (0, 0))).astype(jnp.bfloat16)      # (Ip, 4Hp)
    w_hh = jnp.pad(pad_gate_cols(raw["w_hh"].T),
                   ((0, Hp - H), (0, 0))).astype(jnp.bfloat16)      # (Hp, 4Hp)
    b_cat = pad_gate_cols((raw["b_ih"] + raw["b_hh"])[None, :]
                          ).astype(jnp.float32)                     # (1, 4Hp)

    w_out = jnp.pad(raw["w_out"].T,
                    ((0, Hp - H), (0, Op - O))).astype(jnp.bfloat16)  # (Hp, Op)
    b_out = jnp.concatenate(
        [raw["b_out"], jnp.full((Op - O,), _NEG_BIG, jnp.float32)])[None, :]

    h0 = jnp.pad(raw["h0"], ((0, 0), (0, Hp - H)))
    c0 = jnp.pad(raw["c0"], ((0, 0), (0, Hp - H)))
    return {"w_ih": w_ih, "w_hh": w_hh, "b_cat": b_cat,
            "w_out": w_out, "b_out": b_out, "h0": h0, "c0": c0,
            "Ip": Ip, "Hp": Hp, "Op": Op}


def init_params(key, input_dims, hidden_dims, output_dims):
    ks = jax.random.split(key, 8)
    I, H, O = input_dims, hidden_dims, output_dims
    k = 1.0 / jnp.sqrt(H)
    raw = {
        # PyTorch storage: W_ih (4H, I), W_hh (4H, H), Linear W (O, H).
        "w_ih": jax.random.uniform(ks[0], (4 * H, I), jnp.float32, -k, k),
        "w_hh": jax.random.uniform(ks[1], (4 * H, H), jnp.float32, -k, k),
        "b_ih": jax.random.uniform(ks[2], (4 * H,), jnp.float32, -k, k),
        "b_hh": jax.random.uniform(ks[3], (4 * H,), jnp.float32, -k, k),
        "w_out": jax.random.uniform(ks[4], (O, H), jnp.float32, -k, k),
        "b_out": jax.random.uniform(ks[5], (O,), jnp.float32, -k, k),
        "h0": jax.random.normal(ks[6], (1, H), jnp.float32),
        "c0": jax.random.normal(ks[7], (1, H), jnp.float32),
    }
    return {"raw": raw, "packed": _pack_params(raw, I, H, O), "dims": (I, H, O)}


# --------------------------------------------------------------------------- #
# Pure-JAX references (unpadded, f32, PyTorch layout)
# --------------------------------------------------------------------------- #
def _reference_step(x, h, c, raw):
    H = h.shape[1]
    gates = x @ raw["w_ih"].T + raw["b_ih"] + h @ raw["w_hh"].T + raw["b_hh"]
    i_g = jax.nn.sigmoid(gates[:, 0 * H:1 * H])
    f_g = jax.nn.sigmoid(gates[:, 1 * H:2 * H])
    g_g = jnp.tanh(gates[:, 2 * H:3 * H])
    o_g = jax.nn.sigmoid(gates[:, 3 * H:4 * H])
    c_new = f_g * c + i_g * g_g
    h_new = o_g * jnp.tanh(c_new)
    p = jax.nn.softmax(c_new @ raw["w_out"].T + raw["b_out"], axis=1)
    return h_new, c_new, p


def _reference_recurrent(x_series, raw, H):
    B, _, T = x_series.shape
    h = jnp.broadcast_to(raw["h0"], (B, H))
    c = jnp.broadcast_to(raw["c0"], (B, H))
    outs = []
    for t in range(T):
        h, c, p = _reference_step(x_series[:, :, t], h, c, raw)
        outs.append(p)
    return jnp.concatenate(outs, axis=0)


# --------------------------------------------------------------------------- #
if __name__ == "__main__":
    B, INPUT, HIDDEN, OUTPUT, T = 8, 16, 32, 16, 6

    key = jax.random.PRNGKey(0)
    k_p, k_x, k_h, k_c, k_s = jax.random.split(key, 5)
    params = init_params(k_p, INPUT, HIDDEN, OUTPUT)

    # --- single forward step (LSTM.forward) ---
    x = jax.random.normal(k_x, (B, INPUT), jnp.float32)
    h = jax.random.normal(k_h, (B, HIDDEN), jnp.float32)
    c = jax.random.normal(k_c, (B, HIDDEN), jnp.float32)

    h_new, c_new, p = lstm_forward(x, h, c, params)
    jax.block_until_ready((h_new, c_new, p))

    h_ref, c_ref, p_ref = _reference_step(x, h, c, params["raw"])
    assert h_new.shape == (B, HIDDEN) and c_new.shape == (B, HIDDEN) and p.shape == (B, OUTPUT)
    # bf16 matmul operands + EUP approx reciprocal in softmax -> looser tolerance vs f32 ref
    assert jnp.allclose(h_new, h_ref, atol=2e-2), "h mismatch"
    assert jnp.allclose(c_new, c_ref, atol=2e-2), "c mismatch"
    assert jnp.allclose(p, p_ref, atol=2e-2), "p mismatch"

    # --- recurrent forward over a sequence (LSTM.recurrent_forward) ---
    x_series = jax.random.normal(k_s, (B, INPUT, T), jnp.float32)
    series_out = recurrent_forward(x_series, params)
    jax.block_until_ready(series_out)
    series_ref = _reference_recurrent(x_series, params["raw"], HIDDEN)
    assert series_out.shape == (T * B, OUTPUT)
    assert jnp.allclose(series_out, series_ref, atol=2e-2), "sequence p mismatch"

    print("KERNEL_OK")
</pallas_src>

<mosaic_0001>
module attributes {stable_mosaic.version = 11 : i64} {
  func.func @_lstm_chunk_kernel(%arg0: i32, %arg1: memref<8x128xf32, #tpu.memory_space<vmem>>, %arg2: memref<8x128xf32, #tpu.memory_space<vmem>>, %arg3: memref<8x128xf32, #tpu.memory_space<vmem>>, %arg4: memref<128x512xbf16, #tpu.memory_space<vmem>>, %arg5: memref<128x512xbf16, #tpu.memory_space<vmem>>, %arg6: memref<1x512xf32, #tpu.memory_space<vmem>>, %arg7: memref<128x128xbf16, #tpu.memory_space<vmem>>, %arg8: memref<1x128xf32, #tpu.memory_space<vmem>>, %arg9: memref<8x128xf32, #tpu.memory_space<vmem>>, %arg10: memref<8x128xf32, #tpu.memory_space<vmem>>, %arg11: memref<8x128xf32, #tpu.memory_space<vmem>>, %arg12: memref<8x512xf32, #tpu.memory_space<vmem>>) attributes {dimension_semantics = [#tpu.dimension_semantics<arbitrary>], iteration_bounds = array<i64: 1>, scalar_prefetch = 0 : i64, scratch_operands = 1 : i64, tpu.core_type = #tpu.core_type<tc>, window_params = [{transform_indices = @transform_0, window_bounds = array<i64: 8, 128>}, {pipeline_mode = #tpu.pipeline_mode<synchronous>, transform_indices = @transform_1, window_bounds = array<i64: 8, 128>}, {pipeline_mode = #tpu.pipeline_mode<synchronous>, transform_indices = @transform_2, window_bounds = array<i64: 8, 128>}, {pipeline_mode = #tpu.pipeline_mode<synchronous>, transform_indices = @transform_3, window_bounds = array<i64: 128, 512>}, {pipeline_mode = #tpu.pipeline_mode<synchronous>, transform_indices = @transform_4, window_bounds = array<i64: 128, 512>}, {pipeline_mode = #tpu.pipeline_mode<synchronous>, transform_indices = @transform_5, window_bounds = array<i64: 1, 512>}, {pipeline_mode = #tpu.pipeline_mode<synchronous>, transform_indices = @transform_6, window_bounds = array<i64: 128, 128>}, {pipeline_mode = #tpu.pipeline_mode<synchronous>, transform_indices = @transform_7, window_bounds = array<i64: 1, 128>}, {transform_indices = @transform_8, window_bounds = array<i64: 8, 128>}, {pipeline_mode = #tpu.pipeline_mode<synchronous>, transform_indices = @transform_9, window_bounds = array<i64: 8, 128>}, {pipeline_mode = #tpu.pipeline_mode<synchronous>, transform_indices = @transform_10, window_bounds = array<i64: 8, 128>}]} {
    %c0_i32 = arith.constant 0 : i32
    %0 = arith.cmpi eq, %arg0, %c0_i32 : i32
    %1 = arith.extui %0 : i1 to i32
    %c0_i32_0 = arith.constant 0 : i32
    %2 = arith.cmpi ne, %1, %c0_i32_0 : i32
    scf.if %2 {
      %c0_33 = arith.constant 0 : index
      %c0_34 = arith.constant 0 : index
      %62 = vector.load %arg2[%c0_33, %c0_34] : memref<8x128xf32, #tpu.memory_space<vmem>>, vector<8x128xf32>
      %c0_35 = arith.constant 0 : index
      %c0_36 = arith.constant 0 : index
      %63 = vector.load %arg10[%c0_35, %c0_36] : memref<8x128xf32, #tpu.memory_space<vmem>>, vector<8x128xf32>
      tpu.vector_store %arg10[%c0_35, %c0_36], %62 {strides = array<i32>} : memref<8x128xf32, #tpu.memory_space<vmem>>, vector<8x128xf32>,
      %c0_37 = arith.constant 0 : index
      %c0_38 = arith.constant 0 : index
      %64 = vector.load %arg3[%c0_37, %c0_38] : memref<8x128xf32, #tpu.memory_space<vmem>>, vector<8x128xf32>
      %c0_39 = arith.constant 0 : index
      %c0_40 = arith.constant 0 : index
      %65 = vector.load %arg11[%c0_39, %c0_40] : memref<8x128xf32, #tpu.memory_space<vmem>>, vector<8x128xf32>
      tpu.vector_store %arg11[%c0_39, %c0_40], %64 {strides = array<i32>} : memref<8x128xf32, #tpu.memory_space<vmem>>, vector<8x128xf32>,
    } else {
    }
    %c0 = arith.constant 0 : index
    %c0_1 = arith.constant 0 : index
    %3 = vector.load %arg1[%c0, %c0_1] : memref<8x128xf32, #tpu.memory_space<vmem>>, vector<8x128xf32>
    %4 = arith.truncf %3 : vector<8x128xf32> to vector<8x128xbf16>
    %c0_2 = arith.constant 0 : index
    %c0_3 = arith.constant 0 : index
    %5 = vector.load %arg4[%c0_2, %c0_3] : memref<128x512xbf16, #tpu.memory_space<vmem>>, vector<128x512xbf16>
    %cst = arith.constant dense<0.000000e+00> : vector<8x512xf32>
    %6 = tpu.matmul %4, %5, %cst {dimension_numbers = #tpu.dot_dimension_numbers<[1], [0], [0], [1], [0, 0, 1, 1], [], []>} : vector<8x128xbf16>, vector<128x512xbf16>, vector<8x512xf32> -> vector<8x512xf32>
    %c0_4 = arith.constant 0 : index
    %c0_5 = arith.constant 0 : index
    %7 = vector.load %arg6[%c0_4, %c0_5] : memref<1x512xf32, #tpu.memory_space<vmem>>, vector<1x512xf32>
    %8 = vector.broadcast %7 : vector<1x512xf32> to vector<8x512xf32>
    %9 = arith.addf %6, %8 : vector<8x512xf32>
    %c0_6 = arith.constant 0 : index
    %c0_7 = arith.constant 0 : index
    %10 = vector.load %arg12[%c0_6, %c0_7] : memref<8x512xf32, #tpu.memory_space<vmem>>, vector<8x512xf32>
    tpu.vector_store %arg12[%c0_6, %c0_7], %9 {strides = array<i32>} : memref<8x512xf32, #tpu.memory_space<vmem>>, vector<8x512xf32>,
    %c0_8 = arith.constant 0 : index
    %c0_9 = arith.constant 0 : index
    %11 = vector.load %arg10[%c0_8, %c0_9] : memref<8x128xf32, #tpu.memory_space<vmem>>, vector<8x128xf32>
    %c0_10 = arith.constant 0 : index
    %c0_11 = arith.constant 0 : index
    %12 = vector.load %arg11[%c0_10, %c0_11] : memref<8x128xf32, #tpu.memory_space<vmem>>, vector<8x128xf32>
    %c0_12 = arith.constant 0 : index
    %c0_13 = arith.constant 0 : index
    %13 = vector.load %arg12[%c0_12, %c0_13] : memref<8x512xf32, #tpu.memory_space<vmem>>, vector<8x512xf32>
    %14 = arith.truncf %11 : vector<8x128xf32> to vector<8x128xbf16>
    %c0_14 = arith.constant 0 : index
    %c0_15 = arith.constant 0 : index
    %15 = vector.load %arg5[%c0_14, %c0_15] : memref<128x512xbf16, #tpu.memory_space<vmem>>, vector<128x512xbf16>
    %cst_16 = arith.constant dense<0.000000e+00> : vector<8x512xf32>
    %16 = tpu.matmul %14, %15, %cst_16 {dimension_numbers = #tpu.dot_dimension_numbers<[1], [0], [0], [1], [0, 0, 1, 1], [], []>} : vector<8x128xbf16>, vector<128x512xbf16>, vector<8x512xf32> -> vector<8x512xf32>
    %17 = arith.addf %13, %16 : vector<8x512xf32>
    %18 = vector.extract_strided_slice %17 {offsets = [0, 0], sizes = [8, 128], strides = [1, 1]} : vector<8x512xf32> to vector<8x128xf32>
    %19 = arith.negf %18 : vector<8x128xf32>
    %20 = math.exp %19 : vector<8x128xf32>
    %cst_17 = arith.constant 1.000000e+00 : f32
    %21 = vector.broadcast %cst_17 : f32 to vector<8x128xf32>
    %22 = arith.addf %21, %20 : vector<8x128xf32>
    %23 = arith.divf %21, %22 : vector<8x128xf32>
    %24 = vector.extract_strided_slice %17 {offsets = [0, 128], sizes = [8, 128], strides = [1, 1]} : vector<8x512xf32> to vector<8x128xf32>
    %25 = arith.negf %24 : vector<8x128xf32>
    %26 = math.exp %25 : vector<8x128xf32>
    %cst_18 = arith.constant 1.000000e+00 : f32
    %27 = vector.broadcast %cst_18 : f32 to vector<8x128xf32>
    %28 = arith.addf %27, %26 : vector<8x128xf32>
    %29 = arith.divf %27, %28 : vector<8x128xf32>
    %30 = vector.extract_strided_slice %17 {offsets = [0, 256], sizes = [8, 128], strides = [1, 1]} : vector<8x512xf32> to vector<8x128xf32>
    %31 = math.tanh %30 : vector<8x128xf32>
    %32 = vector.extract_strided_slice %17 {offsets = [0, 384], sizes = [8, 128], strides = [1, 1]} : vector<8x512xf32> to vector<8x128xf32>
    %33 = arith.negf %32 : vector<8x128xf32>
    %34 = math.exp %33 : vector<8x128xf32>
    %cst_19 = arith.constant 1.000000e+00 : f32
    %35 = vector.broadcast %cst_19 : f32 to vector<8x128xf32>
    %36 = arith.addf %35, %34 : vector<8x128xf32>
    %37 = arith.divf %35, %36 : vector<8x128xf32>
    %38 = arith.mulf %29, %12 : vector<8x128xf32>
    %39 = arith.mulf %23, %31 : vector<8x128xf32>
    %40 = arith.addf %38, %39 : vector<8x128xf32>
    %41 = math.tanh %40 : vector<8x128xf32>
    %42 = arith.mulf %37, %41 : vector<8x128xf32>
    %43 = arith.truncf %40 : vector<8x128xf32> to vector<8x128xbf16>
    %c0_20 = arith.constant 0 : index
    %c0_21 = arith.constant 0 : index
    %44 = vector.load %arg7[%c0_20, %c0_21] : memref<128x128xbf16, #tpu.memory_space<vmem>>, vector<128x128xbf16>
    %cst_22 = arith.constant dense<0.000000e+00> : vector<8x128xf32>
    %45 = tpu.matmul %43, %44, %cst_22 {dimension_numbers = #tpu.dot_dimension_numbers<[1], [0], [0], [1], [0, 0, 1, 1], [], []>} : vector<8x128xbf16>, vector<128x128xbf16>, vector<8x128xf32> -> vector<8x128xf32>
    %c0_23 = arith.constant 0 : index
    %c0_24 = arith.constant 0 : index
    %46 = vector.load %arg8[%c0_23, %c0_24] : memref<1x128xf32, #tpu.memory_space<vmem>>, vector<1x128xf32>
    %47 = vector.broadcast %46 : vector<1x128xf32> to vector<8x128xf32>
    %48 = arith.addf %45, %47 : vector<8x128xf32>
    %cst_25 = arith.constant dense<0xFF800000> : vector<8xf32>
    %49 = vector.multi_reduction <maximumf>, %48, %cst_25 [1] : vector<8x128xf32> to vector<8xf32>
    %50 = vector.shape_cast %49 : vector<8xf32> to vector<8x1xf32>
    %51 = vector.broadcast %50 : vector<8x1xf32> to vector<8x128xf32>
    %52 = arith.subf %48, %51 : vector<8x128xf32>
    %53 = math.exp %52 : vector<8x128xf32>
    %cst_26 = arith.constant dense<0.000000e+00> : vector<8xf32>
    %54 = vector.multi_reduction <add>, %53, %cst_26 [1] : vector<8x128xf32> to vector<8xf32>
    %55 = vector.shape_cast %54 : vector<8xf32> to vector<8x1xf32>
    %56 = tpu.reciprocal %55 {approx = true} : vector<8x1xf32> -> vector<8x1xf32>
    %57 = vector.broadcast %56 : vector<8x1xf32> to vector<8x128xf32>
    %58 = arith.mulf %53, %57 : vector<8x128xf32>
    %c0_27 = arith.constant 0 : index
    %c0_28 = arith.constant 0 : index
    %59 = vector.load %arg9[%c0_27, %c0_28] : memref<8x128xf32, #tpu.memory_space<vmem>>, vector<8x128xf32>
    tpu.vector_store %arg9[%c0_27, %c0_28], %58 {strides = array<i32>} : memref<8x128xf32, #tpu.memory_space<vmem>>, vector<8x128xf32>,
    %c0_29 = arith.constant 0 : index
    %c0_30 = arith.constant 0 : index
    %60 = vector.load %arg10[%c0_29, %c0_30] : memref<8x128xf32, #tpu.memory_space<vmem>>, vector<8x128xf32>
    tpu.vector_store %arg10[%c0_29, %c0_30], %42 {strides = array<i32>} : memref<8x128xf32, #tpu.memory_space<vmem>>, vector<8x128xf32>,
    %c0_31 = arith.constant 0 : index
    %c0_32 = arith.constant 0 : index
    %61 = vector.load %arg11[%c0_31, %c0_32] : memref<8x128xf32, #tpu.memory_space<vmem>>, vector<8x128xf32>
    tpu.vector_store %arg11[%c0_31, %c0_32], %40 {strides = array<i32>} : memref<8x128xf32, #tpu.memory_space<vmem>>, vector<8x128xf32>,
    return
  }
  func.func @transform_0(%arg0: i32) -> (i32, i32) {
    %c0_i32 = arith.constant 0 : i32
    %c0_i32_0 = arith.constant 0 : i32
    return %arg0, %c0_i32 : i32, i32
  }
  func.func @transform_1(%arg0: i32) -> (i32, i32) {
    %c0_i32 = arith.constant 0 : i32
    %c0_i32_0 = arith.constant 0 : i32
    %c0_i32_1 = arith.constant 0 : i32
    return %c0_i32, %c0_i32_0 : i32, i32
  }
  func.func @transform_2(%arg0: i32) -> (i32, i32) {
    %c0_i32 = arith.constant 0 : i32
    %c0_i32_0 = arith.constant 0 : i32
    %c0_i32_1 = arith.constant 0 : i32
    return %c0_i32, %c0_i32_0 : i32, i32
  }
  func.func @transform_3(%arg0: i32) -> (i32, i32) {
    %c0_i32 = arith.constant 0 : i32
    %c0_i32_0 = arith.constant 0 : i32
    %c0_i32_1 = arith.constant 0 : i32
    return %c0_i32, %c0_i32_0 : i32, i32
  }
  func.func @transform_4(%arg0: i32) -> (i32, i32) {
    %c0_i32 = arith.constant 0 : i32
    %c0_i32_0 = arith.constant 0 : i32
    %c0_i32_1 = arith.constant 0 : i32
    return %c0_i32, %c0_i32_0 : i32, i32
  }
  func.func @transform_5(%arg0: i32) -> (i32, i32) {
    %c0_i32 = arith.constant 0 : i32
    %c0_i32_0 = arith.constant 0 : i32
    %c0_i32_1 = arith.constant 0 : i32
    return %c0_i32, %c0_i32_0 : i32, i32
  }
  func.func @transform_6(%arg0: i32) -> (i32, i32) {
    %c0_i32 = arith.constant 0 : i32
    %c0_i32_0 = arith.constant 0 : i32
    %c0_i32_1 = arith.constant 0 : i32
    return %c0_i32, %c0_i32_0 : i32, i32
  }
  func.func @transform_7(%arg0: i32) -> (i32, i32) {
    %c0_i32 = arith.constant 0 : i32
    %c0_i32_0 = arith.constant 0 : i32
    %c0_i32_1 = arith.constant 0 : i32
    return %c0_i32, %c0_i32_0 : i32, i32
  }
  func.func @transform_8(%arg0: i32) -> (i32, i32) {
    %c0_i32 = arith.constant 0 : i32
    %c0_i32_0 = arith.constant 0 : i32
    return %arg0, %c0_i32 : i32, i32
  }
  func.func @transform_9(%arg0: i32) -> (i32, i32) {
    %c0_i32 = arith.constant 0 : i32
    %c0_i32_0 = arith.constant 0 : i32
    %c0_i32_1 = arith.constant 0 : i32
    return %c0_i32, %c0_i32_0 : i32, i32
  }
  func.func @transform_10(%arg0: i32) -> (i32, i32) {
    %c0_i32 = arith.constant 0 : i32
    %c0_i32_0 = arith.constant 0 : i32
    %c0_i32_1 = arith.constant 0 : i32
    return %c0_i32, %c0_i32_0 : i32, i32
  }
}

</mosaic_0001>

<bundles_post_ra>
// kernel: tpu_custom_call.1
= control target key start
LH: loop header
LB: loop body
LE: loop exit
PB: predicated region body
PF: predicated region fallthrough
CT: control target
= control target key end

     0   :  { %16 = vsyncpa [#allocation4], 0  ;;  %s1575_s0 = inlined_call_operand.hbm [shape: f32[8,128], index: 0, kind: input, shape index: {}]   ;;  %s1576_s1 = inlined_call_operand.hbm [shape: f32[8,128], index: 1, kind: input, shape index: {}]   ;;  %s1577_s2 = inlined_call_operand.hbm [shape: f32[8,128], index: 2, kind: input, shape index: {}]   ;;  %s1578_s3 = inlined_call_operand.hbm [shape: bf16[128,512], index: 3, kind: input, shape index: {}]   ;;  %s1579_s4 = inlined_call_operand.hbm [shape: bf16[128,512], index: 4, kind: input, shape index: {}]   ;;  %s1580_s5 = inlined_call_operand.vmem [shape: f32[1,512], index: 5, kind: input, shape index: {}]   ;;  %s1581_s6 = inlined_call_operand.hbm [shape: bf16[128,128], index: 6, kind: input, shape index: {}]   ;;  %s1582_s7 = inlined_call_operand.vmem [shape: f32[1,128], index: 7, kind: input, shape index: {}]   ;;  %s1583_s8 = inlined_call_operand.hbm [shape: f32[8,128], index: 8, kind: output, shape index: {0}]   ;;  %s1584_s9 = inlined_call_operand.hbm [shape: f32[8,128], index: 9, kind: output, shape index: {1}]   ;;  %s1585_s10 = inlined_call_operand.hbm [shape: f32[8,128], index: 10, kind: output, shape index: {2}]  }
   0x1   :  { %17 = vsyncpa [#allocation7], 0 }
   0x2   :  { %18 = vsyncpa [#allocation10], 0 }
   0x3   :  { %19 = vsyncpa [#allocation13], 0 }
   0x4   :  { %20 = vsyncpa [#allocation5], 0 }
   0x5   :  { %21 = vsyncpa [#allocation16], 0  ;;  %s1366_s13 = smov [#allocation6]   ;;  %s1367_s15 = smov [#allocation9]  }
   0x6   :  { %s38_s14 = sshll.u32 %s1366_s13, 4  ;;  %s57_s16 = sshll.u32 %s1367_s15, 4  ;;  %s39_s14 = int_to_ptr.vmem [resolvable:$true] %s38_s14  ;;  %s1437_s16 = int_to_ptr.vmem [resolvable:$true] %s57_s16 }
   0x7   :  { %s1156_s19 = scalar_lea.hbm %s1576_s1, 128 }
   0x8   :  { %p1157_p0 = scmp.ne.s32.totalorder %s1576_s1, %s1156_s19  ;;  %p1160_p1 = scmp.lt.u32.totalorder %s1156_s19, %s1576_s1 }
   0xa   :  { %p1162_p2 = pnand %p1160_p1, %p1157_p0 }
   0xc   :  { %1165 = shalt.err (!%p1162_p2)
}
   0xd   :  { %s1166_s24 = scalar_lea.vmem %s39_s14, 128  ;;  %p1171_p4 = scmp.lt.s32.totalorder %s39_s14, %s39_s14 }
   0xe   :  { %p1167_p3 = scmp.ne.s32.totalorder %s39_s14, %s1166_s24  ;;  %p1172_p5 = scmp.lt.s32.totalorder %s1166_s24, %s1166_s24 }
  0x10   :  { %p1173_p6 = por %p1172_p5, %p1171_p4 }
  0x12   :  { %p1174_p7 = pnand %p1173_p6, %p1167_p3 }
  0x14   :  { %1177 = shalt.err (!%p1174_p7)
}
  0x15   :  { %41 = dma.hbm_to_vmem [thread:$0]  %s1576_s1, 128, %s39_s14, [#allocation7]  }
  0x16   :  { %s1178_s29 = scalar_lea.hbm %s1578_s3, 4096 }
  0x17   :  { %p1179_p8 = scmp.ne.s32.totalorder %s1578_s3, %s1178_s29  ;;  %p1182_p9 = scmp.lt.u32.totalorder %s1178_s29, %s1578_s3 }
  0x19   :  { %p1184_p10 = pnand %p1182_p9, %p1179_p8 }
  0x1b   :  { %1187 = shalt.err (!%p1184_p10)
}
  0x1c   :  { %s1188_s15 = scalar_lea.vmem %s1437_s16, 4096  ;;  %p1193_p12 = scmp.lt.s32.totalorder %s1437_s16, %s1437_s16 }
  0x1d   :  { %p1189_p11 = scmp.ne.s32.totalorder %s1437_s16, %s1188_s15  ;;  %p1194_p13 = scmp.lt.s32.totalorder %s1188_s15, %s1188_s15 }
  0x1f   :  { %p1195_p0 = por %p1194_p13, %p1193_p12 }
  0x21   :  { %p1196_p1 = pnand %p1195_p0, %p1189_p11 }
  0x23   :  { %1199 = shalt.err (!%p1196_p1)
}
  0x24   :  { %s1368_s1 = smov 256   ;;  %s1369_s14 = smov 16  }
  0x25   :  { %63 = dma.hbm_to_vmem [thread:$0]  %s1578_s3, 4096, %s1437_s16, [#allocation10], %s1368_s1, %s1368_s1, %s1369_s14  }
  0x26   :  { %s1370_s19 = smov [#allocation3]   ;;  %s1371_s21 = smov [#allocation8]  }
  0x27   :  { %s28_s20 = sshll.u32 %s1370_s19, 4  ;;  %s48_s22 = sshll.u32 %s1371_s21, 4  ;;  %s29_s20 = int_to_ptr.vmem [resolvable:$true] %s28_s20  ;;  %s49_s22 = int_to_ptr.vmem [resolvable:$true] %s48_s22 }
  0x28   :  { %s1200_s25 = scalar_lea.hbm %s1575_s0, 128 }
  0x29   :  { %p1201_p2 = scmp.ne.s32.totalorder %s1575_s0, %s1200_s25  ;;  %p1204_p3 = scmp.lt.u32.totalorder %s1200_s25, %s1575_s0 }
  0x2b   :  { %p1206_p4 = pnand %p1204_p3, %p1201_p2 }
  0x2d   :  { %1209 = shalt.err (!%p1206_p4)
}
  0x2e   :  { %s1210_s3 = scalar_lea.vmem %s29_s20, 128  ;;  %p1215_p6 = scmp.lt.s32.totalorder %s29_s20, %s29_s20 }
  0x2f   :  { %p1211_p5 = scmp.ne.s32.totalorder %s29_s20, %s1210_s3  ;;  %p1216_p7 = scmp.lt.s32.totalorder %s1210_s3, %s1210_s3 }
  0x31   :  { %p1217_p8 = por %p1216_p7, %p1215_p6 }
  0x33   :  { %p1218_p9 = pnand %p1217_p8, %p1211_p5 }
  0x35   :  { %1221 = shalt.err (!%p1218_p9)
}
  0x36   :  { %31 = dma.hbm_to_vmem [thread:$0]  %s1575_s0, 128, %s29_s20, [#allocation4]  }
  0x37   :  { %s1222_s13 = scalar_lea.hbm %s1577_s2, 128 }
  0x38   :  { %p1223_p10 = scmp.ne.s32.totalorder %s1577_s2, %s1222_s13  ;;  %p1226_p11 = scmp.lt.u32.totalorder %s1222_s13, %s1577_s2 }
  0x3a   :  { %p1228_p12 = pnand %p1226_p11, %p1223_p10 }
  0x3c   :  { %1231 = shalt.err (!%p1228_p12)
}
  0x3d   :  { %s1232_s21 = scalar_lea.vmem %s49_s22, 128  ;;  %p1237_p0 = scmp.lt.s32.totalorder %s49_s22, %s49_s22 }
  0x3e   :  { %p1233_p13 = scmp.ne.s32.totalorder %s49_s22, %s1232_s21  ;;  %p1238_p1 = scmp.lt.s32.totalorder %s1232_s21, %s1232_s21 }
  0x40   :  { %p1239_p2 = por %p1238_p1, %p1237_p0 }
  0x42   :  { %p1240_p3 = pnand %p1239_p2, %p1233_p13 }
  0x44   :  { %1243 = shalt.err (!%p1240_p3)
}
  0x45   :  { %51 = dma.hbm_to_vmem [thread:$0]  %s1577_s2, 128, %s49_s22, [#allocation7]  }
  0x46   :  { %s1372_s23 = smov [#allocation11]   ;;  %s1373_s25 = smov [#allocation12]  }
  0x47   :  { %s69_s24 = sshll.u32 %s1372_s23, 4  ;;  %s83_s26 = sshll.u32 %s1373_s25, 4  ;;  %s70_s24 = int_to_ptr.vmem [resolvable:$true] %s69_s24  ;;  %s1495_s26 = int_to_ptr.vmem [resolvable:$true] %s83_s26 }
  0x48   :  { %s1244_s29 = scalar_lea.hbm %s1579_s4, 4096 }
  0x49   :  { %p1245_p4 = scmp.ne.s32.totalorder %s1579_s4, %s1244_s29  ;;  %p1248_p5 = scmp.lt.u32.totalorder %s1244_s29, %s1579_s4 }
  0x4b   :  { %p1250_p6 = pnand %p1248_p5, %p1245_p4 }
  0x4d   :  { %1253 = shalt.err (!%p1250_p6)
}
  0x4e   :  { %s1254_s2 = scalar_lea.vmem %s70_s24, 4096  ;;  %p1259_p8 = scmp.lt.s32.totalorder %s70_s24, %s70_s24 }
  0x4f   :  { %p1255_p7 = scmp.ne.s32.totalorder %s70_s24, %s1254_s2  ;;  %p1260_p9 = scmp.lt.s32.totalorder %s1254_s2, %s1254_s2 }
  0x51   :  { %p1261_p10 = por %p1260_p9, %p1259_p8 }
  0x53   :  { %p1262_p11 = pnand %p1261_p10, %p1255_p7 }
  0x55   :  { %1265 = shalt.err (!%p1262_p11)
}
  0x56   :  { %75 = dma.hbm_to_vmem [thread:$0]  %s1579_s4, 4096, %s70_s24, [#allocation10], %s1368_s1, %s1368_s1, %s1369_s14  }
  0x57   :  { %s1266_s17 = scalar_lea.hbm %s1581_s6, 1024 }
  0x58   :  { %p1267_p12 = scmp.ne.s32.totalorder %s1581_s6, %s1266_s17  ;;  %p1270_p13 = scmp.lt.u32.totalorder %s1266_s17, %s1581_s6 }
  0x5a   :  { %p1272_p0 = pnand %p1270_p13, %p1267_p12 }
  0x5c   :  { %1275 = shalt.err (!%p1272_p0)
}
  0x5d   :  { %s1276_s20 = scalar_lea.vmem %s1495_s26, 1024  ;;  %p1281_p2 = scmp.lt.s32.totalorder %s1495_s26, %s1495_s26 }
  0x5e   :  { %p1277_p1 = scmp.ne.s32.totalorder %s1495_s26, %s1276_s20  ;;  %p1282_p3 = scmp.lt.s32.totalorder %s1276_s20, %s1276_s20 }
  0x60   :  { %p1283_p4 = por %p1282_p3, %p1281_p2 }
  0x62   :  { %p1284_p5 = pnand %p1283_p4, %p1277_p1 }
  0x64   :  { %1287 = shalt.err (!%p1284_p5)
}
  0x65   :  { %s1374_s4 = smov 64   ;;  %s1375_s1 = smov 4  }
  0x66   :  { %89 = dma.hbm_to_vmem [thread:$0]  %s1581_s6, 1024, %s1495_s26, [#allocation13], %s1374_s4, %s1374_s4, %s1375_s1  }
  0x67   :  { %1354 = dma.done.wait [#allocation4], 128  }
  0x68   :  { %1355 = vsyncadd [#allocation4], 4294967168 }
  0x69   :  { %1356 = dma.done.wait [#allocation7], 256  }
  0x6a   :  { %1357 = vsyncadd [#allocation7], 4294967040 }
  0x6b   :  { %1358 = dma.done.wait [#allocation10], 8192  }
  0x6c   :  { %1359 = vsyncadd [#allocation10], 4294959104 }
  0x6d   :  { %1360 = dma.done.wait [#allocation13], 1024  }
  0x6e   :  { %1361 = vsyncadd [#allocation13], 4294966272  ;;  %v1376_v0 = vmov 0   ;;  %v1032_v1 = vld [vmem:[#allocation9 + $0x4] ss:$16 sps:$4 sm:$0xff]   ;;  %v119_v33 = vld [vmem:[#allocation3] sm:$0xff] }
  0x6f   :  { %367 = vmatprep.mubr.bf16.mxu0 %v1376_v0  ;;  %408 = vmatprep.mubr.bf16.mxu1 %v1376_v0  ;;  %v1034_v2 = vld [vmem:[#allocation9 + $0xc] ss:$16 sps:$4 sm:$0xff]   ;;  %v1036_v3 = vld [vmem:[#allocation9] ss:$16 sps:$4 sm:$0xff]   ;;  %v1037_v4 = vld [vmem:[#allocation9 + $0x8] ss:$16 sps:$4 sm:$0xff]   ;;  %v120_v37 = vpack.c.bf16 %v119_v33, %v119_v33 }
  0x70   :  { %335 = vmatprep.subr.bf16.mxu0 %v1032_v1  ;;  %376 = vmatprep.subr.bf16.mxu1 %v1034_v2  ;;  %v1038_v5 = vld [vmem:[#allocation9 + $0x24] ss:$16 sps:$4 sm:$0xff]   ;;  %v1040_v6 = vld [vmem:[#allocation9 + $0x2c] ss:$16 sps:$4 sm:$0xff]   ;;  %v1042_v7 = vld [vmem:[#allocation9 + $0x20] ss:$16 sps:$4 sm:$0xff]  }
  0x71   :  { %336 = vmatpush1.bf16.msra.mxu0 %v1036_v3  ;;  %377 = vmatpush1.bf16.msra.mxu1 %v1037_v4  ;;  %v1043_v8 = vld [vmem:[#allocation9 + $0x28] ss:$16 sps:$4 sm:$0xff]   ;;  %v1044_v9 = vld [vmem:[#allocation9 + $0x44] ss:$16 sps:$4 sm:$0xff]   ;;  %v1046_v10 = vld [vmem:[#allocation9 + $0x4c] ss:$16 sps:$4 sm:$0xff]  }
  0x72   :  { %337 = vmatprep.subr.bf16.mxu0 %v1038_v5  ;;  %378 = vmatprep.subr.bf16.mxu1 %v1040_v6  ;;  %v1048_v11 = vld [vmem:[#allocation9 + $0x40] ss:$16 sps:$4 sm:$0xff]   ;;  %v1049_v12 = vld [vmem:[#allocation9 + $0x48] ss:$16 sps:$4 sm:$0xff]   ;;  %v1050_v13 = vld [vmem:[#allocation9 + $0x64] ss:$16 sps:$4 sm:$0xff]  }
  0x73   :  { %v1052_v14 = vld [vmem:[#allocation9 + $0x6c] ss:$16 sps:$4 sm:$0xff]   ;;  %v1054_v15 = vld [vmem:[#allocation9 + $0x60] ss:$16 sps:$4 sm:$0xff]   ;;  %v1055_v16 = vld [vmem:[#allocation9 + $0x68] ss:$16 sps:$4 sm:$0xff]  }
  0x74   :  { %v1056_v17 = vld [vmem:[#allocation9 + $0x84] ss:$16 sps:$4 sm:$0xff]   ;;  %v1058_v18 = vld [vmem:[#allocation9 + $0x8c] ss:$16 sps:$4 sm:$0xff]   ;;  %v1060_v19 = vld [vmem:[#allocation9 + $0x80] ss:$16 sps:$4 sm:$0xff]  }
  0x75   :  { %338 = vmatpush1.bf16.msra.mxu0 %v1042_v7  ;;  %379 = vmatpush1.bf16.msra.mxu1 %v1043_v8  ;;  %v1061_v20 = vld [vmem:[#allocation9 + $0x88] ss:$16 sps:$4 sm:$0xff]   ;;  %v1062_v21 = vld [vmem:[#allocation9 + $0xa4] ss:$16 sps:$4 sm:$0xff]   ;;  %v1064_v22 = vld [vmem:[#allocation9 + $0xac] ss:$16 sps:$4 sm:$0xff]  }
  0x76   :  { %339 = vmatprep.subr.bf16.mxu0 %v1044_v9  ;;  %380 = vmatprep.subr.bf16.mxu1 %v1046_v10  ;;  %v1066_v23 = vld [vmem:[#allocation9 + $0xa0] ss:$16 sps:$4 sm:$0xff]   ;;  %v1067_v24 = vld [vmem:[#allocation9 + $0xa8] ss:$16 sps:$4 sm:$0xff]   ;;  %v1068_v25 = vld [vmem:[#allocation9 + $0xc4] ss:$16 sps:$4 sm:$0xff]  }
  0x77   :  { %v1070_v26 = vld [vmem:[#allocation9 + $0xcc] ss:$16 sps:$4 sm:$0xff]   ;;  %v1072_v27 = vld [vmem:[#allocation9 + $0xc0] ss:$16 sps:$4 sm:$0xff]   ;;  %v1073_v28 = vld [vmem:[#allocation9 + $0xc8] ss:$16 sps:$4 sm:$0xff]  }
  0x78   :  { %v1074_v29 = vld [vmem:[#allocation9 + $0xe4] ss:$16 sps:$4 sm:$0xff]   ;;  %v1076_v30 = vld [vmem:[#allocation9 + $0xec] ss:$16 sps:$4 sm:$0xff]   ;;  %v1078_v31 = vld [vmem:[#allocation9 + $0xe0] ss:$16 sps:$4 sm:$0xff]  }
  0x79   :  { %340 = vmatpush1.bf16.msra.mxu0 %v1048_v11  ;;  %381 = vmatpush1.bf16.msra.mxu1 %v1049_v12  ;;  %v1079_v32 = vld [vmem:[#allocation9 + $0xe8] ss:$16 sps:$4 sm:$0xff]   ;;  %v1082_v34 = vld [vmem:[#allocation11 + $0x4] ss:$16 sps:$4 sm:$0xff]   ;;  %v1085_v35 = vld [vmem:[#allocation11 + $0xc] ss:$16 sps:$4 sm:$0xff]  }
  0x7a   :  { %341 = vmatprep.subr.bf16.mxu0 %v1050_v13  ;;  %382 = vmatprep.subr.bf16.mxu1 %v1052_v14  ;;  %v1080_v36 = vld [vmem:[#allocation11] ss:$16 sps:$4 sm:$0xff]   ;;  %v1083_v38 = vld [vmem:[#allocation11 + $0x8] ss:$16 sps:$4 sm:$0xff]   ;;  %v1088_v39 = vld [vmem:[#allocation11 + $0x24] ss:$16 sps:$4 sm:$0xff]   ;;  %v155_v14 = vlaneseq }
  0x7b   :  { %v1091_v40 = vld [vmem:[#allocation11 + $0x2c] ss:$16 sps:$4 sm:$0xff]   ;;  %v1086_v41 = vld [vmem:[#allocation11 + $0x20] ss:$16 sps:$4 sm:$0xff]   ;;  %v1089_v42 = vld [vmem:[#allocation11 + $0x28] ss:$16 sps:$4 sm:$0xff]  }
  0x7c   :  { %v1094_v43 = vld [vmem:[#allocation11 + $0x44] ss:$16 sps:$4 sm:$0xff]   ;;  %v1097_v44 = vld [vmem:[#allocation11 + $0x4c] ss:$16 sps:$4 sm:$0xff]   ;;  %v1092_v45 = vld [vmem:[#allocation11 + $0x40] ss:$16 sps:$4 sm:$0xff]  }
  0x7d   :  { %342 = vmatpush1.bf16.msra.mxu0 %v1054_v15  ;;  %383 = vmatpush1.bf16.msra.mxu1 %v1055_v16  ;;  %v1095_v46 = vld [vmem:[#allocation11 + $0x48] ss:$16 sps:$4 sm:$0xff]   ;;  %v1100_v47 = vld [vmem:[#allocation11 + $0x64] ss:$16 sps:$4 sm:$0xff]   ;;  %v1103_v48 = vld [vmem:[#allocation11 + $0x6c] ss:$16 sps:$4 sm:$0xff]  }
  0x7e   :  { %343 = vmatprep.subr.bf16.mxu0 %v1056_v17  ;;  %384 = vmatprep.subr.bf16.mxu1 %v1058_v18  ;;  %v1098_v49 = vld [vmem:[#allocation11 + $0x60] ss:$16 sps:$4 sm:$0xff]   ;;  %v1101_v50 = vld [vmem:[#allocation11 + $0x68] ss:$16 sps:$4 sm:$0xff]   ;;  %v1106_v51 = vld [vmem:[#allocation11 + $0x84] ss:$16 sps:$4 sm:$0xff]  }
  0x7f   :  { %v1109_v52 = vld [vmem:[#allocation11 + $0x8c] ss:$16 sps:$4 sm:$0xff]   ;;  %v1104_v53 = vld [vmem:[#allocation11 + $0x80] ss:$16 sps:$4 sm:$0xff]   ;;  %v1107_v54 = vld [vmem:[#allocation11 + $0x88] ss:$16 sps:$4 sm:$0xff]  }
  0x80   :  { %v1112_v55 = vld [vmem:[#allocation11 + $0xa4] ss:$16 sps:$4 sm:$0xff]   ;;  %v1115_v56 = vld [vmem:[#allocation11 + $0xac] ss:$16 sps:$4 sm:$0xff]   ;;  %v1110_v57 = vld [vmem:[#allocation11 + $0xa0] ss:$16 sps:$4 sm:$0xff]  }
  0x81   :  { %344 = vmatpush1.bf16.msra.mxu0 %v1060_v19  ;;  %385 = vmatpush1.bf16.msra.mxu1 %v1061_v20  ;;  %v1113_v58 = vld [vmem:[#allocation11 + $0xa8] ss:$16 sps:$4 sm:$0xff]   ;;  %v1118_v59 = vld [vmem:[#allocation11 + $0xc4] ss:$16 sps:$4 sm:$0xff]   ;;  %v1121_v60 = vld [vmem:[#allocation11 + $0xcc] ss:$16 sps:$4 sm:$0xff]  }
  0x82   :  { %345 = vmatprep.subr.bf16.mxu0 %v1062_v21  ;;  %386 = vmatprep.subr.bf16.mxu1 %v1064_v22  ;;  %v1116_v61 = vld [vmem:[#allocation11 + $0xc0] ss:$16 sps:$4 sm:$0xff]   ;;  %v1119_v62 = vld [vmem:[#allocation11 + $0xc8] ss:$16 sps:$4 sm:$0xff]   ;;  %v1124_v63 = vld [vmem:[#allocation11 + $0xe4] ss:$16 sps:$4 sm:$0xff]  }
  0x83   :  { %v1122_v1 = vld [vmem:[#allocation11 + $0xe0] ss:$16 sps:$4 sm:$0xff]   ;;  %v1125_v2 = vld [vmem:[#allocation11 + $0xe8] ss:$16 sps:$4 sm:$0xff]   ;;  %v1377_v6 = vmov 0.0   ;;  %vm1378_vm0 = vmmov 0  }
  0x84   :  { %v115_v3 = vld [vmem:[#allocation6] sm:$0xff]  ;;  %v1128_v5 = vld [vmem:[#allocation12] sm:$0xff]   ;;  %v1129_v7 = vld [vmem:[#allocation12 + $0x8] sm:$0xff]   ;;  %v156_v15 = vshrl.u32 %v155_v14, 7  ;;  %s1379_s26 = smov [#allocation15]  }
  0x85   :  { %346 = vmatpush1.bf16.msra.mxu0 %v1066_v23  ;;  %387 = vmatpush1.bf16.msra.mxu1 %v1067_v24  ;;  %v427_v4 = vpack.c.bf16 %v115_v3, %v115_v3  ;;  %v1130_v8 = vld [vmem:[#allocation12 + $0x10] sm:$0xff]   ;;  %v1131_v9 = vld [vmem:[#allocation12 + $0x18] sm:$0xff]   ;;  %v1132_v10 = vld [vmem:[#allocation12 + $0x20] sm:$0xff]   ;;  %s870_s27 = sshll.u32 %s1379_s26, 4  ;;  %s871_s27 = int_to_ptr.vmem [resolvable:$true] %s870_s27 }
  0x86   :  { %347 = vmatprep.subr.bf16.mxu0 %v1068_v25  ;;  %388 = vmatprep.subr.bf16.mxu1 %v1070_v26  ;;  %v1133_v11 = vld [vmem:[#allocation12 + $0x28] sm:$0xff]   ;;  %v1134_v12 = vld [vmem:[#allocation12 + $0x30] sm:$0xff]   ;;  %v1135_v13 = vld [vmem:[#allocation12 + $0x38] sm:$0xff]   ;;  %v157_v16 = vsub.s32 0, %v156_v15  ;;  %v161_v18 = vsub.s32 1, %v156_v15  ;;  %v169_v23 = vsub.s32 3, %v156_v15  ;;  %p1293_p7 = scmp.lt.s32.totalorder %s871_s27, %s871_s27 }
  0x87   :  { %v153_v17 = vld [vmem:[%s1580_s5] sm:$0xf]  ;;  %s1288_s28 = scalar_lea.vmem %s871_s27, 128 }
  0x88   :  { %v158_v19 = vrot.slane %v153_v17, %v157_v16  ;;  %v162_v20 = vrot.slane %v153_v17, %v161_v18  ;;  %p1289_p6 = scmp.ne.s32.totalorder %s871_s27, %s1288_s28  ;;  %p1294_p8 = scmp.lt.s32.totalorder %s1288_s28, %s1288_s28 }
  0x89   :  { %348 = vmatpush1.bf16.msra.mxu0 %v1072_v27  ;;  %389 = vmatpush1.bf16.msra.mxu1 %v1073_v28 }
  0x8a   :  { %349 = vmatprep.subr.bf16.mxu0 %v1074_v29  ;;  %390 = vmatprep.subr.bf16.mxu1 %v1076_v30  ;;  %p1295_p9 = por %p1294_p8, %p1293_p7 }
  0x8c   :  { %p1296_p10 = pnand %p1295_p9, %p1289_p6 }
  0x8d   :  { %350 = vmatpush1.bf16.msra.mxu0 %v1078_v31  ;;  %391 = vmatpush1.bf16.msra.mxu1 %v1079_v32 }
  0x8e   :  { %620 = vmatprep.subr.bf16.mxu0 %v1082_v34  ;;  %661 = vmatprep.subr.bf16.mxu1 %v1085_v35  ;;  %v170_v34 = vrot.slane %v153_v17, %v169_v23  ;;  %v165_v35 = vsub.s32 2, %v156_v15 }
  0x90   :  { %368 = vmatmul.mubr.bf16.vlgmr.msra.gmra.mrb[0].mxu0 %v120_v37  ;;  %409 = vmatmul.mubr.bf16.vlgmr.msra.gmra.mrb[0].mxu1 %v120_v37  ;;  %v166_v37 = vrot.slane %v153_v17, %v165_v35 }
  0x91   :  { %621 = vmatpush1.bf16.msra.mxu0 %v1080_v36  ;;  %662 = vmatpush1.bf16.msra.mxu1 %v1083_v38 }
  0x92   :  { %622 = vmatprep.subr.bf16.mxu0 %v1088_v39  ;;  %663 = vmatprep.subr.bf16.mxu1 %v1091_v40 }
  0x93   :  { %652 = vmatprep.mubr.bf16.mxu0 %v1376_v0  ;;  %693 = vmatprep.mubr.bf16.mxu1 %v1376_v0  ;;  %v1127_v0 = vld [vmem:[#allocation11 + $0xec] ss:$16 sps:$4 sm:$0xff]  }
  0x95   :  { %623 = vmatpush1.bf16.msra.mxu0 %v1086_v41  ;;  %664 = vmatpush1.bf16.msra.mxu1 %v1089_v42 }
  0x96   :  { %624 = vmatprep.subr.bf16.mxu0 %v1094_v43  ;;  %665 = vmatprep.subr.bf16.mxu1 %v1097_v44 }
  0x99   :  { %625 = vmatpush1.bf16.msra.mxu0 %v1092_v45  ;;  %666 = vmatpush1.bf16.msra.mxu1 %v1095_v46  ;;  %v117_v46 = vld [vmem:[#allocation8] sm:$0xff] }
  0x9a   :  { %626 = vmatprep.subr.bf16.mxu0 %v1100_v47  ;;  %667 = vmatprep.subr.bf16.mxu1 %v1103_v48 }
  0x9d   :  { %627 = vmatpush1.bf16.msra.mxu0 %v1098_v49  ;;  %668 = vmatpush1.bf16.msra.mxu1 %v1101_v50 }
  0x9e   :  { %628 = vmatprep.subr.bf16.mxu0 %v1106_v51  ;;  %669 = vmatprep.subr.bf16.mxu1 %v1109_v52 }
  0xa1   :  { %629 = vmatpush1.bf16.msra.mxu0 %v1104_v53  ;;  %670 = vmatpush1.bf16.msra.mxu1 %v1107_v54 }
  0xa2   :  { %630 = vmatprep.subr.bf16.mxu0 %v1112_v55  ;;  %671 = vmatprep.subr.bf16.mxu1 %v1115_v56 }
  0xa5   :  { %631 = vmatpush1.bf16.msra.mxu0 %v1110_v57  ;;  %672 = vmatpush1.bf16.msra.mxu1 %v1113_v58  ;;  %v966_v57 = vld [vmem:[%s1582_s7] ss:$0 sm:$0xff] }
  0xa6   :  { %632 = vmatprep.subr.bf16.mxu0 %v1118_v59  ;;  %673 = vmatprep.subr.bf16.mxu1 %v1121_v60 }
  0xa9   :  { %633 = vmatpush1.bf16.msra.mxu0 %v1116_v61  ;;  %674 = vmatpush1.bf16.msra.mxu1 %v1119_v62 }
  0xaa   :  { %634 = vmatprep.subr.bf16.mxu0 %v1124_v63  ;;  %675 = vmatprep.subr.bf16.mxu1 %v1127_v0 }
  0xad   :  { %635 = vmatpush1.bf16.msra.mxu0 %v1122_v1  ;;  %676 = vmatpush1.bf16.msra.mxu1 %v1125_v2 }
  0xae   :  { %984 = vmatprep.subr.bf16.mxu0 %v1377_v6 }
  0xb0   :  { %653 = vmatmul.mubr.bf16.vlgmr.msra.gmra.mrb[0].mxu0 %v427_v4  ;;  %694 = vmatmul.mubr.bf16.vlgmr.msra.gmra.mrb[0].mxu1 %v427_v4 }
  0xb1   :  { %985 = vmatpush3.bf16.msra.mxu0 %v1128_v5  ;;  %1000 = vmatprep.mubr.msk.bf16.mxu0 %vm1378_vm0, %v1377_v6 }
  0xb2   :  { %986 = vmatprep.subr.bf16.mxu0 %v1377_v6 }
  0xb5   :  { %987 = vmatpush3.bf16.msra.mxu0 %v1129_v7 }
  0xb6   :  { %988 = vmatprep.subr.bf16.mxu0 %v1377_v6 }
  0xb9   :  { %989 = vmatpush3.bf16.msra.mxu0 %v1130_v8 }
  0xba   :  { %990 = vmatprep.subr.bf16.mxu0 %v1377_v6 }
  0xbd   :  { %991 = vmatpush3.bf16.msra.mxu0 %v1131_v9 }
  0xbe   :  { %992 = vmatprep.subr.bf16.mxu0 %v1377_v6 }
  0xc1   :  { %993 = vmatpush3.bf16.msra.mxu0 %v1132_v10 }
  0xc2   :  { %994 = vmatprep.subr.bf16.mxu0 %v1377_v6 }
  0xc5   :  { %995 = vmatpush3.bf16.msra.mxu0 %v1133_v11 }
  0xc6   :  { %996 = vmatprep.subr.bf16.mxu0 %v1377_v6 }
  0xc9   :  { %997 = vmatpush3.bf16.msra.mxu0 %v1134_v12 }
  0xca   :  { %998 = vmatprep.subr.bf16.mxu0 %v1377_v6 }
  0xcd   :  { %999 = vmatpush3.bf16.msra.mxu0 %v1135_v13 }
 0x183   :  { %v654_v21 = vpop.f32.mrb[0].mxu0  ;;  %v695_v22 = vpop.f32.mrb[0].mxu1 }
 0x184   :  { %v1004_v24 = vadd.f32 %v654_v21, %v158_v19  ;;  %v656_v25 = vpop.f32.mrb[1].mxu0  ;;  %v697_v26 = vpop.f32.mrb[1].mxu1  ;;  %v1006_v39 = vadd.f32 %v695_v22, %v166_v37 }
 0x185   :  { %v1005_v27 = vadd.f32 %v656_v25, %v162_v20  ;;  %v658_v28 = vpop.f32.mrb[2].mxu0  ;;  %v699_v29 = vpop.f32.mrb[2].mxu1  ;;  %v1007_v36 = vadd.f32 %v697_v26, %v170_v34 }
 0x186   :  { %v963_v30 = vmul.f32 -1.442695, %v1004_v24  ;;  %v659_v31 = vpop.f32.mrb[3].mxu0  ;;  %v700_v32 = vpop.f32.mrb[3].mxu1 }
 0x187   :  { %v964_v33 = vmul.f32 -1.442695, %v1005_v27  ;;  %v965_v38 = vmul.f32 -1.442695, %v1007_v36 }
 0x188   :  { %1136 = vpow2.f32 %v963_v30 }
 0x189   :  { %1138 = vpow2.f32 %v964_v33 }
 0x18a   :  { %1140 = vpow2.f32 %v965_v38 }
 0x18b   :  { %1142 = vtanh.f32 %v1006_v39 }
 0x192   :  { %v1137_v40 = vpop.eup %1136 }
 0x193   :  { %v1139_v41 = vpop.eup %1138  ;;  %v709_v42 = vadd.f32 1.0, %v1137_v40 }
 0x194   :  { %v715_v43 = vadd.f32 1.0, %v1139_v41  ;;  %v1141_v44 = vpop.eup %1140 }
 0x195   :  { %1144 = vrcp.f32 %v709_v42  ;;  %v1143_v45 = vpop.eup %1142  ;;  %v722_v50 = vadd.f32 1.0, %v1141_v44 }
 0x196   :  { %1146 = vrcp.f32 %v715_v43 }
 0x197   :  { %1148 = vrcp.f32 %v722_v50 }
 0x19f   :  { %v1145_v47 = vpop.eup %1144 }
 0x1a0   :  { %v1147_v48 = vpop.eup %1146  ;;  %v726_v49 = vmul.f32 %v1145_v47, %v1143_v45 }
 0x1a1   :  { %v725_v51 = vmul.f32 %v1147_v48, %v117_v46  ;;  %v1149_v54 = vpop.eup %1148 }
 0x1a3   :  { %v727_v52 = vadd.f32 %v726_v49, %v725_v51 }
 0x1a5   :  { %1150 = vtanh.f32 %v727_v52  ;;  %v730_v53 = vpack.c.bf16 %v727_v52, %v727_v52  ;;  %853 = vst [vmem:[#allocation17] sm:$0xff] %v727_v52 }
 0x1a7   :  { %1001 = vmatmul.mubr.bf16.vlgmr.msra.gmra.mrb[4].mxu0 %v730_v53 }
 0x1af   :  { %v1151_v55 = vpop.eup %1150 }
 0x1b0   :  { %v729_v56 = vmul.f32 %v1151_v55, %v1149_v54 }
 0x1b2   :  { %852 = vst [vmem:[#allocation15] sm:$0xff] %v729_v56 }
 0x27a   :  { %v836_v58 = vpop.f32.mrb[4].mxu0 }
 0x27b   :  { %v837_v59 = vadd.f32 %v966_v57, %v836_v58  ;;  %v1002_v60 = vpop.f32.mrb[5].mxu0 }
 0x27c   :  { %v839_v61 = vpop.f32.mrb[6].mxu0 }
 0x27d   :  { %842 = vmax.xlane.f32.xlu0 %v837_v59  ;;  %v1003_v62 = vpop.f32.mrb[7].mxu0 }
 0x30a   :  { %v843_v63 = vpop.xlane.xlu0 %842 }
 0x30b   :  { %v844_v0 = vsub.f32 %v837_v59, %v843_v63 }
 0x30d   :  { %v845_v1 = vmul.f32 1.442695, %v844_v0 }
 0x30f   :  { %1152 = vpow2.f32 %v845_v1 }
 0x319   :  { %v1153_v2 = vpop.eup %1152 }
 0x31a   :  { %847 = vadd.xlane.f32.xlu0 %v1153_v2 }
 0x31b   :  { %1299 = shalt.err (!%p1296_p10)
}
 0x31c   :  { %s1300_s3 = scalar_lea.hbm %s1584_s9, 128 }
 0x31d   :  { %p1301_p11 = scmp.ne.s32.totalorder %s1584_s9, %s1300_s3  ;;  %p1304_p12 = scmp.lt.u32.totalorder %s1300_s3, %s1584_s9 }
 0x31f   :  { %p1306_p13 = pnand %p1304_p12, %p1301_p11 }
 0x321   :  { %1309 = shalt.err (!%p1306_p13)
}
 0x322   :  { %873 = dma.vmem_to_hbm [thread:$0]  %s871_s27, 128, %s1584_s9, [#allocation16]  }
 0x323   :  { %s1380_s13 = smov [#allocation17]  }
 0x324   :  { %s880_s15 = sshll.u32 %s1380_s13, 4  ;;  %s881_s15 = int_to_ptr.vmem [resolvable:$true] %s880_s15 }
 0x325   :  { %s1310_s17 = scalar_lea.vmem %s881_s15, 128  ;;  %p1315_p1 = scmp.lt.s32.totalorder %s881_s15, %s881_s15 }
 0x326   :  { %p1311_p0 = scmp.ne.s32.totalorder %s881_s15, %s1310_s17  ;;  %p1316_p2 = scmp.lt.s32.totalorder %s1310_s17, %s1310_s17 }
 0x328   :  { %p1317_p3 = por %p1316_p2, %p1315_p1 }
 0x32a   :  { %p1318_p4 = pnand %p1317_p3, %p1311_p0 }
 0x32c   :  { %1321 = shalt.err (!%p1318_p4)
}
 0x32d   :  { %s1322_s21 = scalar_lea.hbm %s1585_s10, 128 }
 0x32e   :  { %p1323_p5 = scmp.ne.s32.totalorder %s1585_s10, %s1322_s21  ;;  %p1326_p6 = scmp.lt.u32.totalorder %s1322_s21, %s1585_s10 }
 0x330   :  { %p1328_p7 = pnand %p1326_p6, %p1323_p5 }
 0x332   :  { %1331 = shalt.err (!%p1328_p7)
}
 0x333   :  { %883 = dma.vmem_to_hbm [thread:$0]  %s881_s15, 128, %s1585_s10, [#allocation16]  }
 0x334   :  { %s1381_s23 = smov [#allocation14]  }
 0x335   :  { %s860_s6 = sshll.u32 %s1381_s23, 4  ;;  %s861_s6 = int_to_ptr.vmem [resolvable:$true] %s860_s6 }
 0x336   :  { %s1332_s24 = scalar_lea.vmem %s861_s6, 128  ;;  %p1337_p9 = scmp.lt.s32.totalorder %s861_s6, %s861_s6 }
 0x337   :  { %p1333_p8 = scmp.ne.s32.totalorder %s861_s6, %s1332_s24  ;;  %p1338_p10 = scmp.lt.s32.totalorder %s1332_s24, %s1332_s24 }
 0x339   :  { %p1339_p11 = por %p1338_p10, %p1337_p9 }
 0x33b   :  { %p1340_p12 = pnand %p1339_p11, %p1333_p8 }
 0x3a7   :  { %v848_v3 = vpop.xlane.xlu0 %847 }
 0x3a8   :  { %1154 = vrcp.f32 %v848_v3 }
 0x3b2   :  { %v1155_v4 = vpop.eup %1154 }
 0x3b3   :  { %v850_v5 = vmul.f32 %v1155_v4, %v1153_v2 }
 0x3b5   :  { %851 = vst [vmem:[#allocation14] sm:$0xff] %v850_v5 }
 0x3b6   :  { %1343 = shalt.err (!%p1340_p12)
}
 0x3b7   :  { %s1344_s26 = scalar_lea.hbm %s1583_s8, 128 }
 0x3b8   :  { %p1345_p13 = scmp.ne.s32.totalorder %s1583_s8, %s1344_s26  ;;  %p1348_p0 = scmp.lt.u32.totalorder %s1344_s26, %s1583_s8 }
 0x3ba   :  { %p1350_p1 = pnand %p1348_p0, %p1345_p13 }
 0x3bc   :  { %1353 = shalt.err (!%p1350_p1)
}
 0x3bd   :  { %863 = dma.vmem_to_hbm [thread:$0]  %s861_s6, 128, %s1583_s8, [#allocation5]  }
 0x3be   :  { %1362 = dma.done.wait [#allocation5], 128  }
 0x3bf   :  { %1363 = vsyncadd [#allocation5], 4294967168 }
 0x3c0   :  { %1364 = dma.done.wait [#allocation16], 256  }
 0x3c1   :  { %1365 = vsyncadd [#allocation16], 4294967040 }
 0x3c2   :  { %893 = vsyncpa [#allocation4], 1 }
 0x3c3   :  { %894 = vsyncpa [#allocation7], 1 }
 0x3c4   :  { %895 = vsyncpa [#allocation10], 1 }
 0x3c5   :  { %896 = vsyncpa [#allocation13], 1 }
 0x3c6   :  { %897 = vsyncpa [#allocation5], 1 }
 0x3c7   :  { %898 = vsyncpa [#allocation16], 1 }

</bundles_post_ra>
